<compile_context>
chip_gen: v7x
topology: tpu7x:2x2x1
jax: 0.10.0
libtpu: 0.0.40
codegen_flags: <defaults>
</compile_context>

<pallas_src>
import jax
import jax.numpy as jnp
from jax.experimental import pallas as pl
from jax.experimental.pallas import tpu as pltpu


def _round_up(x, m):
    return ((x + m - 1) // m) * m


def exit_head_kernel(x_ref, w1_ref, b1_ref, w2_ref, b2_ref, o_ref):
    # x_ref: (tm, D) tile of flattened tokens in the compute dtype (bf16 fast path).
    # MXU matmuls accumulate in f32; bias + tanh math stays f32.
    acc1 = jnp.dot(x_ref[...], w1_ref[...], preferred_element_type=jnp.float32)
    h = jnp.tanh(acc1 + b1_ref[...])                       # f32
    acc2 = jnp.dot(h.astype(w2_ref.dtype), w2_ref[...],    # narrow h for 2nd MXU pass
                   preferred_element_type=jnp.float32)
    o_ref[...] = (acc2 + b2_ref[...]).astype(o_ref.dtype)  # f32 logits


def layoutlmv3_exit_forward(x, w_dense, b_dense, w_out, b_out, *,
                            tm=512, compute_dtype=jnp.bfloat16,
                            out_dtype=jnp.float32):
    """x: [batch, seq, hidden]. Returns [batch, seq, num_labels] logits (f32 by default)."""
    B, S, D = x.shape
    n_labels = w_out.shape[1]
    rows = B * S

    # Row tile: multiple of 8 (sublane granule), capped by the row count.
    # tm=512 maps cleanly onto the 2x256x256 MXU of v6e/v7x; use tm=256 on v5e
    # (or rely on the raised vmem limit below before going bigger).
    tm_eff = min(tm, _round_up(rows, 8))
    # v7x has 2 TensorCores per chip: make sure the "parallel" grid axis has >= 2 steps.
    if rows > 8 and pl.cdiv(rows, tm_eff) < 2:
        tm_eff = _round_up(pl.cdiv(rows, 2), 8)
    grid = (pl.cdiv(rows, tm_eff),)  # ragged last tile masked by Pallas (no jnp.pad)

    # Cast operands to the compute dtype (bf16 default): ~4x MXU throughput on
    # v6e/v7x, ~2x on v5e, and halves x HBM traffic. Biases stay f32.
    x2d = x.reshape(rows, D).astype(compute_dtype)
    w1 = w_dense.astype(compute_dtype)
    w2 = w_out.astype(compute_dtype)
    b1 = b_dense.astype(jnp.float32).reshape(1, D)
    b2 = b_out.astype(jnp.float32).reshape(1, n_labels)

    csize = jnp.dtype(compute_dtype).itemsize
    osize = jnp.dtype(out_dtype).itemsize

    # Advisory cost hint for XLA scheduling around this custom call.
    cost = pl.CostEstimate(
        flops=2 * rows * D * (D + n_labels),
        transcendentals=rows * D,
        bytes_accessed=(x2d.size * csize + w1.size * csize + w2.size * csize
                        + b1.size * 4 + b2.size * 4 + rows * n_labels * osize),
    )

    # Explicit VMEM budget (matters most on v7x: 64 MiB physical / 32 MiB default
    # scoped limit, and on v5e's 16 MiB default scoped limit):
    #   double-buffered x tiles + single-buffered weights/biases +
    #   double-buffered output tiles + f32 kernel-body intermediates (acc1/h/h_cast).
    vmem_budget = (
        2 * tm_eff * D * csize
        + D * D * csize + D * 4
        + D * n_labels * csize + n_labels * 4
        + 2 * tm_eff * n_labels * osize
        + 3 * tm_eff * D * 4
    )
    # Headroom, floored at 32 MiB (>= default scoped limit everywhere) and capped at
    # 48 MiB (safe on v7x's 64 MiB physical VMEM). If the budget exceeds the cap,
    # reduce tm instead of raising the cap.
    vmem_limit = int(min(max(int(vmem_budget * 1.5) + (2 << 20), 32 << 20), 48 << 20))

    out_shape = jax.ShapeDtypeStruct((rows, n_labels), out_dtype)

    def build_and_run(single_buffer_weights):
        def resident(shape):
            idx = lambda i: (0,) * len(shape)  # constant index -> stays resident
            if single_buffer_weights:
                return pl.BlockSpec(shape, idx, pipeline_mode=pl.Buffered(1))
            return pl.BlockSpec(shape, idx)

        return pl.pallas_call(
            exit_head_kernel,
            out_shape=out_shape,
            grid_spec=pl.GridSpec(
                grid=grid,
                in_specs=[
                    pl.BlockSpec((tm_eff, D), lambda i: (i, 0)),  # x tile (pipelined)
                    resident((D, D)),                             # dense weight
                    resident((1, D)),                             # dense bias
                    resident((D, n_labels)),                      # out_proj weight
                    resident((1, n_labels)),                      # out_proj bias
                ],
                out_specs=pl.BlockSpec((tm_eff, n_labels), lambda i: (i, 0)),
            ),
            compiler_params=pltpu.CompilerParams(
                dimension_semantics=("parallel",),
                vmem_limit_bytes=vmem_limit,
            ),
            cost_estimate=cost,
        )(x2d, w1, b1, w2, b2)

    try:
        # Preferred: resident weights single-buffered (saves ~half their VMEM).
        out2d = build_and_run(True)
    except Exception:
        # Fallback if pipeline_mode=pl.Buffered(1) is unsupported in this JAX build.
        out2d = build_and_run(False)

    return out2d.reshape(B, S, n_labels)


if __name__ == "__main__":
    # Small shapes consistent with the module:
    #   batch=2, seq=8, input_dim(hidden)=32, num_labels=4 (RAMP head)
    B, S, D, NUM_LABELS = 2, 8, 32, 4

    key = jax.random.PRNGKey(0)
    kx, kw1, kb1, kw2, kb2 = jax.random.split(key, 5)

    x = jax.random.normal(kx, (B, S, D), dtype=jnp.float32)

    # Deterministic synthetic parameters (nn.Linear shapes, stored as [in, out]).
    w_dense = jax.random.normal(kw1, (D, D), dtype=jnp.float32) * 0.05
    b_dense = jax.random.normal(kb1, (D,), dtype=jnp.float32) * 0.01
    w_out = jax.random.normal(kw2, (D, NUM_LABELS), dtype=jnp.float32) * 0.05
    b_out = jax.random.normal(kb2, (NUM_LABELS,), dtype=jnp.float32) * 0.01

    y = layoutlmv3_exit_forward(x, w_dense, b_dense, w_out, b_out)
    jax.block_until_ready(y)

    # Pure-JAX reference following the same bf16-operand / f32-accumulate path.
    xb = x.reshape(-1, D).astype(jnp.bfloat16)
    w1b = w_dense.astype(jnp.bfloat16)
    w2b = w_out.astype(jnp.bfloat16)
    h = jnp.tanh(jnp.dot(xb, w1b, preferred_element_type=jnp.float32) + b_dense)
    ref = (jnp.dot(h.astype(jnp.bfloat16), w2b, preferred_element_type=jnp.float32)
           + b_out).reshape(B, S, NUM_LABELS)

    assert y.shape == (B, S, NUM_LABELS)
    assert y.dtype == jnp.float32
    assert jnp.allclose(y, ref, atol=2e-2, rtol=2e-2), float(jnp.max(jnp.abs(y - ref)))

    print("KERNEL_OK")
</pallas_src>

<mosaic_0001>
module attributes {stable_mosaic.version = 11 : i64} {
  func.func @exit_head_kernel(%arg0: i32, %arg1: memref<8x32xbf16, #tpu.memory_space<vmem>>, %arg2: memref<32x32xbf16, #tpu.memory_space<vmem>>, %arg3: memref<1x32xf32, #tpu.memory_space<vmem>>, %arg4: memref<32x4xbf16, #tpu.memory_space<vmem>>, %arg5: memref<1x4xf32, #tpu.memory_space<vmem>>, %arg6: memref<8x4xf32, #tpu.memory_space<vmem>>) attributes {dimension_semantics = [#tpu.dimension_semantics<parallel>], iteration_bounds = array<i64: 2>, scalar_prefetch = 0 : i64, scratch_operands = 0 : i64, tpu.core_type = #tpu.core_type<tc>, window_params = [{transform_indices = @transform_0, window_bounds = array<i64: 8, 32>}, {pipeline_mode = #tpu.pipeline_mode<synchronous>, transform_indices = @transform_1, window_bounds = array<i64: 32, 32>}, {pipeline_mode = #tpu.pipeline_mode<synchronous>, transform_indices = @transform_2, window_bounds = array<i64: 1, 32>}, {pipeline_mode = #tpu.pipeline_mode<synchronous>, transform_indices = @transform_3, window_bounds = array<i64: 32, 4>}, {pipeline_mode = #tpu.pipeline_mode<synchronous>, transform_indices = @transform_4, window_bounds = array<i64: 1, 4>}, {transform_indices = @transform_5, window_bounds = array<i64: 8, 4>}]} {
    %c0 = arith.constant 0 : index
    %c0_0 = arith.constant 0 : index
    %0 = vector.load %arg1[%c0, %c0_0] : memref<8x32xbf16, #tpu.memory_space<vmem>>, vector<8x32xbf16>
    %c0_1 = arith.constant 0 : index
    %c0_2 = arith.constant 0 : index
    %1 = vector.load %arg2[%c0_1, %c0_2] : memref<32x32xbf16, #tpu.memory_space<vmem>>, vector<32x32xbf16>
    %cst = arith.constant dense<0.000000e+00> : vector<8x32xf32>
    %2 = tpu.matmul %0, %1, %cst {dimension_numbers = #tpu.dot_dimension_numbers<[1], [0], [0], [1], [0, 0, 1, 1], [], []>} : vector<8x32xbf16>, vector<32x32xbf16>, vector<8x32xf32> -> vector<8x32xf32>
    %c0_3 = arith.constant 0 : index
    %c0_4 = arith.constant 0 : index
    %3 = vector.load %arg3[%c0_3, %c0_4] : memref<1x32xf32, #tpu.memory_space<vmem>>, vector<1x32xf32>
    %4 = vector.broadcast %3 : vector<1x32xf32> to vector<8x32xf32>
    %5 = arith.addf %2, %4 : vector<8x32xf32>
    %6 = math.tanh %5 : vector<8x32xf32>
    %7 = arith.truncf %6 : vector<8x32xf32> to vector<8x32xbf16>
    %c0_5 = arith.constant 0 : index
    %c0_6 = arith.constant 0 : index
    %8 = vector.load %arg4[%c0_5, %c0_6] : memref<32x4xbf16, #tpu.memory_space<vmem>>, vector<32x4xbf16>
    %cst_7 = arith.constant dense<0.000000e+00> : vector<8x4xf32>
    %9 = tpu.matmul %7, %8, %cst_7 {dimension_numbers = #tpu.dot_dimension_numbers<[1], [0], [0], [1], [0, 0, 1, 1], [], []>} : vector<8x32xbf16>, vector<32x4xbf16>, vector<8x4xf32> -> vector<8x4xf32>
    %c0_8 = arith.constant 0 : index
    %c0_9 = arith.constant 0 : index
    %10 = vector.load %arg5[%c0_8, %c0_9] : memref<1x4xf32, #tpu.memory_space<vmem>>, vector<1x4xf32>
    %11 = vector.broadcast %10 : vector<1x4xf32> to vector<8x4xf32>
    %12 = arith.addf %9, %11 : vector<8x4xf32>
    %c0_10 = arith.constant 0 : index
    %c0_11 = arith.constant 0 : index
    %13 = vector.load %arg6[%c0_10, %c0_11] : memref<8x4xf32, #tpu.memory_space<vmem>>, vector<8x4xf32>
    tpu.vector_store %arg6[%c0_10, %c0_11], %12 {strides = array<i32>} : memref<8x4xf32, #tpu.memory_space<vmem>>, vector<8x4xf32>,
    return
  }
  func.func @transform_0(%arg0: i32) -> (i32, i32) {
    %c0_i32 = arith.constant 0 : i32
    %c0_i32_0 = arith.constant 0 : i32
    return %arg0, %c0_i32 : i32, i32
  }
  func.func @transform_1(%arg0: i32) -> (i32, i32) {
    %c0_i32 = arith.constant 0 : i32
    %c0_i32_0 = arith.constant 0 : i32
    %c0_i32_1 = arith.constant 0 : i32
    return %c0_i32, %c0_i32_0 : i32, i32
  }
  func.func @transform_2(%arg0: i32) -> (i32, i32) {
    %c0_i32 = arith.constant 0 : i32
    %c0_i32_0 = arith.constant 0 : i32
    %c0_i32_1 = arith.constant 0 : i32
    return %c0_i32, %c0_i32_0 : i32, i32
  }
  func.func @transform_3(%arg0: i32) -> (i32, i32) {
    %c0_i32 = arith.constant 0 : i32
    %c0_i32_0 = arith.constant 0 : i32
    %c0_i32_1 = arith.constant 0 : i32
    return %c0_i32, %c0_i32_0 : i32, i32
  }
  func.func @transform_4(%arg0: i32) -> (i32, i32) {
    %c0_i32 = arith.constant 0 : i32
    %c0_i32_0 = arith.constant 0 : i32
    %c0_i32_1 = arith.constant 0 : i32
    return %c0_i32, %c0_i32_0 : i32, i32
  }
  func.func @transform_5(%arg0: i32) -> (i32, i32) {
    %c0_i32 = arith.constant 0 : i32
    %c0_i32_0 = arith.constant 0 : i32
    return %arg0, %c0_i32 : i32, i32
  }
}

module attributes {stable_mosaic.version = 11 : i64} {
  func.func @exit_head_kernel(%arg0: i32, %arg1: memref<8x32xbf16, #tpu.memory_space<vmem>>, %arg2: memref<32x32xbf16, #tpu.memory_space<vmem>>, %arg3: memref<1x32xf32, #tpu.memory_space<vmem>>, %arg4: memref<32x4xbf16, #tpu.memory_space<vmem>>, %arg5: memref<1x4xf32, #tpu.memory_space<vmem>>, %arg6: memref<8x4xf32, #tpu.memory_space<vmem>>) attributes {dimension_semantics = [#tpu.dimension_semantics<parallel>], iteration_bounds = array<i64: 2>, scalar_prefetch = 0 : i64, scratch_operands = 0 : i64, tpu.core_type = #tpu.core_type<tc>, window_params = [{transform_indices = @transform_0, window_bounds = array<i64: 8, 32>}, {pipeline_mode = #tpu.pipeline_mode<synchronous>, transform_indices = @transform_1, window_bounds = array<i64: 32, 32>}, {pipeline_mode = #tpu.pipeline_mode<synchronous>, transform_indices = @transform_2, window_bounds = array<i64: 1, 32>}, {pipeline_mode = #tpu.pipeline_mode<synchronous>, transform_indices = @transform_3, window_bounds = array<i64: 32, 4>}, {pipeline_mode = #tpu.pipeline_mode<synchronous>, transform_indices = @transform_4, window_bounds = array<i64: 1, 4>}, {transform_indices = @transform_5, window_bounds = array<i64: 8, 4>}]} {
    %c0 = arith.constant 0 : index
    %c0_0 = arith.constant 0 : index
    %0 = vector.load %arg1[%c0, %c0_0] : memref<8x32xbf16, #tpu.memory_space<vmem>>, vector<8x32xbf16>
    %c0_1 = arith.constant 0 : index
    %c0_2 = arith.constant 0 : index
    %1 = vector.load %arg2[%c0_1, %c0_2] : memref<32x32xbf16, #tpu.memory_space<vmem>>, vector<32x32xbf16>
    %cst = arith.constant dense<0.000000e+00> : vector<8x32xf32>
    %2 = tpu.matmul %0, %1, %cst {dimension_numbers = #tpu.dot_dimension_numbers<[1], [0], [0], [1], [0, 0, 1, 1], [], []>} : vector<8x32xbf16>, vector<32x32xbf16>, vector<8x32xf32> -> vector<8x32xf32>
    %c0_3 = arith.constant 0 : index
    %c0_4 = arith.constant 0 : index
    %3 = vector.load %arg3[%c0_3, %c0_4] : memref<1x32xf32, #tpu.memory_space<vmem>>, vector<1x32xf32>
    %4 = vector.broadcast %3 : vector<1x32xf32> to vector<8x32xf32>
    %5 = arith.addf %2, %4 : vector<8x32xf32>
    %6 = math.tanh %5 : vector<8x32xf32>
    %7 = arith.truncf %6 : vector<8x32xf32> to vector<8x32xbf16>
    %c0_5 = arith.constant 0 : index
    %c0_6 = arith.constant 0 : index
    %8 = vector.load %arg4[%c0_5, %c0_6] : memref<32x4xbf16, #tpu.memory_space<vmem>>, vector<32x4xbf16>
    %cst_7 = arith.constant dense<0.000000e+00> : vector<8x4xf32>
    %9 = tpu.matmul %7, %8, %cst_7 {dimension_numbers = #tpu.dot_dimension_numbers<[1], [0], [0], [1], [0, 0, 1, 1], [], []>} : vector<8x32xbf16>, vector<32x4xbf16>, vector<8x4xf32> -> vector<8x4xf32>
    %c0_8 = arith.constant 0 : index
    %c0_9 = arith.constant 0 : index
    %10 = vector.load %arg5[%c0_8, %c0_9] : memref<1x4xf32, #tpu.memory_space<vmem>>, vector<1x4xf32>
    %11 = vector.broadcast %10 : vector<1x4xf32> to vector<8x4xf32>
    %12 = arith.addf %9, %11 : vector<8x4xf32>
    %c0_10 = arith.constant 0 : index
    %c0_11 = arith.constant 0 : index
    %13 = vector.load %arg6[%c0_10, %c0_11] : memref<8x4xf32, #tpu.memory_space<vmem>>, vector<8x4xf32>
    tpu.vector_store %arg6[%c0_10, %c0_11], %12 {strides = array<i32>} : memref<8x4xf32, #tpu.memory_space<vmem>>, vector<8x4xf32>,
    return
  }
  func.func @transform_0(%arg0: i32) -> (i32, i32) {
    %c0_i32 = arith.constant 0 : i32
    %c0_i32_0 = arith.constant 0 : i32
    return %arg0, %c0_i32 : i32, i32
  }
  func.func @transform_1(%arg0: i32) -> (i32, i32) {
    %c0_i32 = arith.constant 0 : i32
    %c0_i32_0 = arith.constant 0 : i32
    %c0_i32_1 = arith.constant 0 : i32
    return %c0_i32, %c0_i32_0 : i32, i32
  }
  func.func @transform_2(%arg0: i32) -> (i32, i32) {
    %c0_i32 = arith.constant 0 : i32
    %c0_i32_0 = arith.constant 0 : i32
    %c0_i32_1 = arith.constant 0 : i32
    return %c0_i32, %c0_i32_0 : i32, i32
  }
  func.func @transform_3(%arg0: i32) -> (i32, i32) {
    %c0_i32 = arith.constant 0 : i32
    %c0_i32_0 = arith.constant 0 : i32
    %c0_i32_1 = arith.constant 0 : i32
    return %c0_i32, %c0_i32_0 : i32, i32
  }
  func.func @transform_4(%arg0: i32) -> (i32, i32) {
    %c0_i32 = arith.constant 0 : i32
    %c0_i32_0 = arith.constant 0 : i32
    %c0_i32_1 = arith.constant 0 : i32
    return %c0_i32, %c0_i32_0 : i32, i32
  }
  func.func @transform_5(%arg0: i32) -> (i32, i32) {
    %c0_i32 = arith.constant 0 : i32
    %c0_i32_0 = arith.constant 0 : i32
    return %arg0, %c0_i32 : i32, i32
  }
}

</mosaic_0001>

<bundles_post_ra>
// kernel: tpu_custom_call.1
= control target key start
LH: loop header
LB: loop body
LE: loop exit
PB: predicated region body
PF: predicated region fallthrough
CT: control target
= control target key end

     0   :  { %10 = vsyncpa [#allocation3], 0  ;;  %s757_s0 = inlined_call_operand.hbm [shape: bf16[16,32], index: 0, kind: input, shape index: {}]   ;;  %s758_s1 = inlined_call_operand.vmem [shape: bf16[32,32], index: 1, kind: input, shape index: {}]   ;;  %s759_s2 = inlined_call_operand.vmem [shape: f32[1,32], index: 2, kind: input, shape index: {}]   ;;  %s760_s3 = inlined_call_operand.vmem [shape: bf16[32,4], index: 3, kind: input, shape index: {}]   ;;  %s761_s4 = inlined_call_operand.vmem [shape: f32[1,4], index: 4, kind: input, shape index: {}]   ;;  %s762_s5 = inlined_call_operand.vmem [shape: f32[16,4], index: 5, kind: output, shape index: {}]  }
   0x1   :  { %12 = vsyncpa [#allocation3 + $0x1], 0  ;;  %s630_s18 = smov 0   ;;  %s632_s19 = smov 0  }
   0x2   :  { %s634_s20 = smov 0   ;;  %s636_s21 = smov 0  }
   0x3 LB: > { %s649_s22 = sadd.s32 4294967295, %s595_s21   ;;  %s652_s23 = sadd.s32 1, %s595_s21   ;;  %s595_s21 = sphi %s636_s21, %s770_s21   ;;  %s591_s20 = sphi %s634_s20, %s769_s20   ;;  %s587_s19 = sphi %s632_s19, %s768_s19   ;;  %s583_s18 = sphi %s630_s18, %s767_s18  }
   0x4   : > { %s22_s24 = ssub.s32 %s595_s21, %s652_s23  ;;  %s25_s25 = sadd.s32 1, %s591_s20 }
   0x5   : > { %p23_p0 = scmp.eq.s32.totalorder %s22_s24, 0  ;;  %p32_p1 = scmp.ne.s32.totalorder %s591_s20, %s587_s19 }
   0x6   : > { %p33_p2 = scmp.eq.s32.totalorder %s595_s21, 0  ;;  %p38_p3 = scmp.ne.s32.totalorder %s587_s19, %s583_s18 }
   0x7   : > { %s662_s26 = scalar_select %p23_p0, %s591_s20, %s25_s25  }
   0x8   : > { %p34_p4 = por %p33_p2, %p32_p1  ;;  %p39_p5 = scmp.eq.s32.totalorder %s649_s22, 0 }
   0x9   : > { %p490_p6 = scmp.lt.s32.totalorder %s595_s21, 2  ;;  %s184_s28 = sand.u32 1, %s591_s20  }
   0xa   : > { %p666_p7 = por %p39_p5, %p38_p3  ;;  %s447_s29 = sshll.u32 %s184_s28, 2 }
   0xb   : > { %s448_s30 = sshll.u32 %s595_s21, 6  ;;  %s188_s9 = scalar_lea.vmem [#allocation2], %s447_s29 }
   0xc   : > { %s675_s8 = scalar_lea.hbm %s757_s0, %s448_s30  ;;  %s195_s10 = sshll.u32 %s188_s9, 4  ;;  %s677_s10 = int_to_ptr.vmem [resolvable:$true] %s195_s10 }
   0xd   : > { %p679_p8 = pnand %p490_p6, %p34_p4  ;;  %s185_s12 = scalar_lea.sflag [#allocation3], %s184_s28 }
   0xe   : > { %s531_s13 = scalar_lea.hbm %s675_s8, 64  ;;  %s536_s16 = scalar_lea.hbm %s757_s0, 128 }
   0xf   : > { %p532_p11 = scmp.ne.s32.totalorder %s675_s8, %s531_s13  ;;  %p533_p12 = pneg %p679_p8 }
  0x10   : > { %p537_p1 = scmp.lt.u32.totalorder %s675_s8, %s757_s0  ;;  %p538_p2 = scmp.lt.u32.totalorder %s536_s16, %s531_s13 }
  0x11   : > { %p534_p13 = pnand %p533_p12, %p532_p11  ;;  %p540_p4 = scmp.lt.u32.totalorder %s531_s13, %s675_s8 }
  0x12   : > { %p539_p3 = por %p538_p2, %p537_p1 }
  0x13   : > { %p535_p0 = pneg %p534_p13 }
  0x14   : > { %p541_p5 = por %p540_p4, %p539_p3 }
  0x16   : > { %p542_p6 = pnand %p541_p5, %p535_p0 }
  0x18   : > { %545 = shalt.err (!%p542_p6)
}
  0x19   : > { %s546_s24 = scalar_lea.vmem %s677_s10, 64  ;;  %s597_s25 = smov [#allocation2]  }
  0x1a   : > { %p547_p11 = scmp.ne.s32.totalorder %s677_s10, %s546_s24  ;;  %s551_s28 = sshll.u32 %s597_s25, 4  ;;  %s552_s28 = int_to_ptr.vmem [resolvable:$false] %s551_s28 }
  0x1b   : > { %s553_s29 = scalar_lea.vmem %s552_s28, 128  ;;  %p554_p10 = scmp.lt.s32.totalorder %s677_s10, %s552_s28 }
  0x1c   : > { %p549_p13 = pnand %p547_p11, %p533_p12  ;;  %p555_p1 = scmp.lt.s32.totalorder %s553_s29, %s546_s24 }
  0x1e   : > { %p550_p9 = pneg %p549_p13  ;;  %p556_p2 = por %p555_p1, %p554_p10 }
  0x20   : > { %p557_p3 = pnand %p556_p2, %p550_p9 }
  0x22   : > { %560 = shalt.err (!%p557_p3)
}
  0x23   : > { %489 = dma.hbm_to_vmem [thread:$0]  (!%p679_p8), %s675_s8, 64, %s677_s10, %s185_s12  }
  0x24   : > { %p765_p0 = scmp.lt.s32.totalorder %s595_s21, 3  ;;  %p766_p4 = scmp.ge.s32.totalorder %s595_s21, 1 }
  0x26   : > { %p201_p12 = pnand %p766_p4, %p765_p0 }
  0x27   : > { %s206_s30 = sand.u32 (!%p201_p12), 1, %s587_s19  }
  0x28   : > { %204 = sbr.rel (%p201_p12) target bundleno = 500 (0x1f4), region = 40  ;;  %s450_s6 = sshll.u32 (!%p201_p12), %s206_s30, 2 }
  0x29   : > { %s207_s7 = scalar_lea.sflag (!%p201_p12), [#allocation3], %s206_s30  ;;  %s210_s9 = scalar_lea.vmem (!%p201_p12), [#allocation2], %s450_s6 }
  0x2f   : > { %578 = dma.done.wait (%p666_p7), %s207_s7, 64  }
  0x30   : > { %580 = vsyncadd (%p666_p7), %s207_s7, 4294967232  ;;  %v598_v0 = vmov 0.0   ;;  %vm599_vm0 = vmmov 0   ;;  %v525_v1 = vld [vmem:[%s758_s1] sm:$0xff]   ;;  %v526_v2 = vld [vmem:[%s758_s1 + $0x8] sm:$0xff]   ;;  %vm265_vm1 = vcmask 261120  }
  0x31   : > { %468 = vmatprep.subr.bf16.mxu0 %v598_v0  ;;  %472 = vmatprep.mubr.msk.bf16.mxu0 %vm599_vm0, %v598_v0  ;;  %v241_v3 = vld [vmem:[%s210_s9] sm:$0xf]  ;;  %v528_v5 = vld [vmem:[%s760_s3 + $0x8] sm:$0xff]   ;;  %p236_p7 = scmp.lt.s32.totalorder %s649_s22, 1  ;;  %vm377_vm2 = vcmask 31744  }
  0x32   : > { %476 = vmatprep.subr.bf16.mxu1 %v598_v0  ;;  %480 = vmatprep.mubr.msk.bf16.mxu1 %vm599_vm0, %v598_v0  ;;  %v527_v4 = vld [vmem:[%s760_s3] sm:$0xff]  }
  0x33   : > { %469 = vmatpush3.bf16.msra.mxu0 %v525_v1  ;;  %477 = vmatpush3.bf16.msra.mxu1 %v527_v4  ;;  %v452_v6 = vld [vmem:[%s759_s2] ss:$0 sm:$0xff]  ;;  %s772_s22 = smov (!%p236_p7, %s649_s22), 1 }
  0x34   : > { %470 = vmatprep.subr.bf16.mxu0 %v598_v0  ;;  %478 = vmatprep.subr.bf16.mxu1 %v598_v0  ;;  %s451_s17 = sshll.u32 %s772_s22, 3  ;;  %v456_v14 = vld [vmem:[%s761_s4] ss:$0 sm:$0xff] }
  0x35   : > { %s239_s29 = scalar_lea.vmem %s762_s5, %s451_s17 }
  0x37   : > { %471 = vmatpush3.bf16.msra.mxu0 %v526_v2  ;;  %479 = vmatpush3.bf16.msra.mxu1 %v528_v5 }
  0x3a   : > { %473 = vmatmul.mubr.msk.bf16.vlgmr.msra.gmra.mrb[0].mxu0 %vm265_vm1, %v241_v3 }
 0x10d   : > { %v303_v7 = vpop.f32.mrb[0].mxu0 }
 0x10e   : > { %v304_v8 = vadd.f32 %v452_v6, %v303_v7  ;;  %v474_v9 = vpop.f32.mrb[1].mxu0 }
 0x10f   : > { %v306_v10 = vpop.f32.mrb[2].mxu0 }
 0x110   : > { %529 = vtanh.f32 %v304_v8  ;;  %v475_v11 = vpop.f32.mrb[3].mxu0 }
 0x11a   : > { %v530_v12 = vpop.eup %529 }
 0x11b   : > { %v310_v13 = vpack.c.bf16 %v530_v12, %v530_v12 }
 0x11d   : > { %481 = vmatmul.mubr.msk.bf16.vlgmr.msra.gmra.mrb[0].mxu1 %vm265_vm1, %v310_v13 }
 0x1f0   : > { %v371_v15 = vpop.f32.mrb[0].mxu1 }
 0x1f1   : > { %v372_v16 = vadd.f32 %v456_v14, %v371_v15  ;;  %v482_v17 = vpop.f32.mrb[1].mxu1 }
 0x1f2   : > { %v374_v18 = vpop.f32.mrb[2].mxu1 }
 0x1f3   : > { %378 = vst.msk [vmem:[%s239_s29] sm:$0xff] %vm377_vm2, %v372_v16  ;;  %v483_v19 = vpop.f32.mrb[3].mxu1 }
 0x1f4 PF: > { %p15_p8 = scmp.ge.s32.totalorder %s652_s23, 4   ;;  %s767_s18 = smov %s587_s19 }
 0x1f5   : > { %s768_s19 = smov %s591_s20  ;;  %s769_s20 = smov %s662_s26 }
 0x1f6   : > { %s770_s21 = smov %s652_s23  ;;  %17 = sbr.rel (!%p15_p8) target bundleno = 3 (0x3), region = 80 }
 0x1fd   :  { %398 = vsyncpa [#allocation3], 1 }
 0x1fe   :  { %400 = vsyncpa [#allocation3 + $0x1], 1 }

// kernel: tpu_custom_call.1
= control target key start
LH: loop header
LB: loop body
LE: loop exit
PB: predicated region body
PF: predicated region fallthrough
CT: control target
= control target key end

     0   :  { %10 = vsyncpa [#allocation3], 0  ;;  %s757_s0 = inlined_call_operand.hbm [shape: bf16[16,32], index: 0, kind: input, shape index: {}]   ;;  %s758_s1 = inlined_call_operand.vmem [shape: bf16[32,32], index: 1, kind: input, shape index: {}]   ;;  %s759_s2 = inlined_call_operand.vmem [shape: f32[1,32], index: 2, kind: input, shape index: {}]   ;;  %s760_s3 = inlined_call_operand.vmem [shape: bf16[32,4], index: 3, kind: input, shape index: {}]   ;;  %s761_s4 = inlined_call_operand.vmem [shape: f32[1,4], index: 4, kind: input, shape index: {}]   ;;  %s762_s5 = inlined_call_operand.vmem [shape: f32[16,4], index: 5, kind: output, shape index: {}]  }
   0x1   :  { %12 = vsyncpa [#allocation3 + $0x1], 0  ;;  %s630_s18 = smov 0   ;;  %s632_s19 = smov 0  }
   0x2   :  { %s634_s20 = smov 0   ;;  %s636_s21 = smov 0  }
   0x3 LB: > { %s649_s22 = sadd.s32 4294967295, %s595_s21   ;;  %s652_s23 = sadd.s32 1, %s595_s21   ;;  %s595_s21 = sphi %s636_s21, %s770_s21   ;;  %s591_s20 = sphi %s634_s20, %s769_s20   ;;  %s587_s19 = sphi %s632_s19, %s768_s19   ;;  %s583_s18 = sphi %s630_s18, %s767_s18  }
   0x4   : > { %s22_s24 = ssub.s32 %s595_s21, %s652_s23  ;;  %s25_s25 = sadd.s32 1, %s591_s20 }
   0x5   : > { %p23_p0 = scmp.eq.s32.totalorder %s22_s24, 0  ;;  %p32_p1 = scmp.ne.s32.totalorder %s591_s20, %s587_s19 }
   0x6   : > { %p33_p2 = scmp.eq.s32.totalorder %s595_s21, 0  ;;  %p38_p3 = scmp.ne.s32.totalorder %s587_s19, %s583_s18 }
   0x7   : > { %s662_s26 = scalar_select %p23_p0, %s591_s20, %s25_s25  }
   0x8   : > { %p34_p4 = por %p33_p2, %p32_p1  ;;  %p39_p5 = scmp.eq.s32.totalorder %s649_s22, 0 }
   0x9   : > { %p490_p6 = scmp.lt.s32.totalorder %s595_s21, 2  ;;  %s184_s28 = sand.u32 1, %s591_s20  }
   0xa   : > { %p666_p7 = por %p39_p5, %p38_p3  ;;  %s447_s29 = sshll.u32 %s184_s28, 2 }
   0xb   : > { %s448_s30 = sshll.u32 %s595_s21, 6  ;;  %s188_s9 = scalar_lea.vmem [#allocation2], %s447_s29 }
   0xc   : > { %s675_s8 = scalar_lea.hbm %s757_s0, %s448_s30  ;;  %s195_s10 = sshll.u32 %s188_s9, 4  ;;  %s677_s10 = int_to_ptr.vmem [resolvable:$true] %s195_s10 }
   0xd   : > { %p679_p8 = pnand %p490_p6, %p34_p4  ;;  %s185_s12 = scalar_lea.sflag [#allocation3], %s184_s28 }
   0xe   : > { %s531_s13 = scalar_lea.hbm %s675_s8, 64  ;;  %s536_s16 = scalar_lea.hbm %s757_s0, 128 }
   0xf   : > { %p532_p11 = scmp.ne.s32.totalorder %s675_s8, %s531_s13  ;;  %p533_p12 = pneg %p679_p8 }
  0x10   : > { %p537_p1 = scmp.lt.u32.totalorder %s675_s8, %s757_s0  ;;  %p538_p2 = scmp.lt.u32.totalorder %s536_s16, %s531_s13 }
  0x11   : > { %p534_p13 = pnand %p533_p12, %p532_p11  ;;  %p540_p4 = scmp.lt.u32.totalorder %s531_s13, %s675_s8 }
  0x12   : > { %p539_p3 = por %p538_p2, %p537_p1 }
  0x13   : > { %p535_p0 = pneg %p534_p13 }
  0x14   : > { %p541_p5 = por %p540_p4, %p539_p3 }
  0x16   : > { %p542_p6 = pnand %p541_p5, %p535_p0 }
  0x18   : > { %545 = shalt.err (!%p542_p6)
}
  0x19   : > { %s546_s24 = scalar_lea.vmem %s677_s10, 64  ;;  %s597_s25 = smov [#allocation2]  }
  0x1a   : > { %p547_p11 = scmp.ne.s32.totalorder %s677_s10, %s546_s24  ;;  %s551_s28 = sshll.u32 %s597_s25, 4  ;;  %s552_s28 = int_to_ptr.vmem [resolvable:$false] %s551_s28 }
  0x1b   : > { %s553_s29 = scalar_lea.vmem %s552_s28, 128  ;;  %p554_p10 = scmp.lt.s32.totalorder %s677_s10, %s552_s28 }
  0x1c   : > { %p549_p13 = pnand %p547_p11, %p533_p12  ;;  %p555_p1 = scmp.lt.s32.totalorder %s553_s29, %s546_s24 }
  0x1e   : > { %p550_p9 = pneg %p549_p13  ;;  %p556_p2 = por %p555_p1, %p554_p10 }
  0x20   : > { %p557_p3 = pnand %p556_p2, %p550_p9 }
  0x22   : > { %560 = shalt.err (!%p557_p3)
}
  0x23   : > { %489 = dma.hbm_to_vmem [thread:$0]  (!%p679_p8), %s675_s8, 64, %s677_s10, %s185_s12  }
  0x24   : > { %p765_p0 = scmp.lt.s32.totalorder %s595_s21, 3  ;;  %p766_p4 = scmp.ge.s32.totalorder %s595_s21, 1 }
  0x26   : > { %p201_p12 = pnand %p766_p4, %p765_p0 }
  0x27   : > { %s206_s30 = sand.u32 (!%p201_p12), 1, %s587_s19  }
  0x28   : > { %204 = sbr.rel (%p201_p12) target bundleno = 500 (0x1f4), region = 40  ;;  %s450_s6 = sshll.u32 (!%p201_p12), %s206_s30, 2 }
  0x29   : > { %s207_s7 = scalar_lea.sflag (!%p201_p12), [#allocation3], %s206_s30  ;;  %s210_s9 = scalar_lea.vmem (!%p201_p12), [#allocation2], %s450_s6 }
  0x2f   : > { %578 = dma.done.wait (%p666_p7), %s207_s7, 64  }
  0x30   : > { %580 = vsyncadd (%p666_p7), %s207_s7, 4294967232  ;;  %v598_v0 = vmov 0.0   ;;  %vm599_vm0 = vmmov 0   ;;  %v525_v1 = vld [vmem:[%s758_s1] sm:$0xff]   ;;  %v526_v2 = vld [vmem:[%s758_s1 + $0x8] sm:$0xff]   ;;  %vm265_vm1 = vcmask 261120  }
  0x31   : > { %468 = vmatprep.subr.bf16.mxu0 %v598_v0  ;;  %472 = vmatprep.mubr.msk.bf16.mxu0 %vm599_vm0, %v598_v0  ;;  %v241_v3 = vld [vmem:[%s210_s9] sm:$0xf]  ;;  %v528_v5 = vld [vmem:[%s760_s3 + $0x8] sm:$0xff]   ;;  %p236_p7 = scmp.lt.s32.totalorder %s649_s22, 1  ;;  %vm377_vm2 = vcmask 31744  }
  0x32   : > { %476 = vmatprep.subr.bf16.mxu1 %v598_v0  ;;  %480 = vmatprep.mubr.msk.bf16.mxu1 %vm599_vm0, %v598_v0  ;;  %v527_v4 = vld [vmem:[%s760_s3] sm:$0xff]  }
  0x33   : > { %469 = vmatpush3.bf16.msra.mxu0 %v525_v1  ;;  %477 = vmatpush3.bf16.msra.mxu1 %v527_v4  ;;  %v452_v6 = vld [vmem:[%s759_s2] ss:$0 sm:$0xff]  ;;  %s772_s22 = smov (!%p236_p7, %s649_s22), 1 }
  0x34   : > { %470 = vmatprep.subr.bf16.mxu0 %v598_v0  ;;  %478 = vmatprep.subr.bf16.mxu1 %v598_v0  ;;  %s451_s17 = sshll.u32 %s772_s22, 3  ;;  %v456_v14 = vld [vmem:[%s761_s4] ss:$0 sm:$0xff] }
  0x35   : > { %s239_s29 = scalar_lea.vmem %s762_s5, %s451_s17 }
  0x37   : > { %471 = vmatpush3.bf16.msra.mxu0 %v526_v2  ;;  %479 = vmatpush3.bf16.msra.mxu1 %v528_v5 }
  0x3a   : > { %473 = vmatmul.mubr.msk.bf16.vlgmr.msra.gmra.mrb[0].mxu0 %vm265_vm1, %v241_v3 }
 0x10d   : > { %v303_v7 = vpop.f32.mrb[0].mxu0 }
 0x10e   : > { %v304_v8 = vadd.f32 %v452_v6, %v303_v7  ;;  %v474_v9 = vpop.f32.mrb[1].mxu0 }
 0x10f   : > { %v306_v10 = vpop.f32.mrb[2].mxu0 }
 0x110   : > { %529 = vtanh.f32 %v304_v8  ;;  %v475_v11 = vpop.f32.mrb[3].mxu0 }
 0x11a   : > { %v530_v12 = vpop.eup %529 }
 0x11b   : > { %v310_v13 = vpack.c.bf16 %v530_v12, %v530_v12 }
 0x11d   : > { %481 = vmatmul.mubr.msk.bf16.vlgmr.msra.gmra.mrb[0].mxu1 %vm265_vm1, %v310_v13 }
 0x1f0   : > { %v371_v15 = vpop.f32.mrb[0].mxu1 }
 0x1f1   : > { %v372_v16 = vadd.f32 %v456_v14, %v371_v15  ;;  %v482_v17 = vpop.f32.mrb[1].mxu1 }
 0x1f2   : > { %v374_v18 = vpop.f32.mrb[2].mxu1 }
 0x1f3   : > { %378 = vst.msk [vmem:[%s239_s29] sm:$0xff] %vm377_vm2, %v372_v16  ;;  %v483_v19 = vpop.f32.mrb[3].mxu1 }
 0x1f4 PF: > { %p15_p8 = scmp.ge.s32.totalorder %s652_s23, 4   ;;  %s767_s18 = smov %s587_s19 }
 0x1f5   : > { %s768_s19 = smov %s591_s20  ;;  %s769_s20 = smov %s662_s26 }
 0x1f6   : > { %s770_s21 = smov %s652_s23  ;;  %17 = sbr.rel (!%p15_p8) target bundleno = 3 (0x3), region = 80 }
 0x1fd   :  { %398 = vsyncpa [#allocation3], 1 }
 0x1fe   :  { %400 = vsyncpa [#allocation3 + $0x1], 1 }

</bundles_post_ra>
